<compile_context>
chip_gen: v7x
topology: tpu7x:2x2x1
jax: 0.10.0
libtpu: 0.0.40
codegen_flags: <defaults>
</compile_context>

<pallas_src>
import math
from functools import partial

import jax
import jax.numpy as jnp
from jax import lax
from jax.experimental import pallas as pl
from jax.experimental.pallas import tpu as pltpu


def _sinusoidal_kernel(time_ref, out_ref, *, half_dim: int, emb_scale: float,
                       lane_aligned: bool):
    # time_ref: (TB, 1)   f32
    # out_ref : (TB, dim) f32, dim = 2 * half_dim
    t = time_ref[...]                                         # (TB, 1)

    if lane_aligned:
        # half_dim % 128 == 0 -> both halves start on a lane boundary:
        # minimal transcendental work + unmasked lane-dense stores.
        idx = lax.broadcasted_iota(jnp.float32, (1, half_dim), 1)
        freqs = jnp.exp(idx * (-emb_scale))                   # (1, half_dim), EUP
        emb = t * freqs                                       # (TB, half_dim)
        out_ref[:, :half_dim] = jnp.sin(emb)
        out_ref[:, half_dim:] = jnp.cos(emb)
    else:
        # Small / unaligned half_dim: build the full-width row in registers and
        # do a single full-block store (no unaligned minor-dim slicing).
        dim = 2 * half_dim
        col = lax.broadcasted_iota(jnp.int32, (1, dim), 1)
        is_cos = col >= half_dim
        k = jnp.where(is_cos, col - half_dim, col).astype(jnp.float32)
        freqs = jnp.exp(k * (-emb_scale))                     # (1, dim)
        emb = t * freqs                                       # (TB, dim)
        out_ref[...] = jnp.where(is_cos, jnp.cos(emb), jnp.sin(emb))


def sinusoidal_pos_emb(time: jax.Array, dim: int, *,
                       batch_tile: int | None = None,
                       max_tile: int = 1024) -> jax.Array:
    """JAX/Pallas equivalent of SinusoidalPosEmb(dim)(time). time: (B,) floats."""
    assert time.ndim == 1, "time must be a 1-D tensor of shape (B,)"
    assert dim % 2 == 0, "dim must be even (the PyTorch module silently drops a column otherwise)"
    assert dim >= 4, "dim must be >= 4 (dim == 2 gives a divide-by-zero frequency scale)"

    half_dim = dim // 2
    emb_scale = math.log(10000.0) / (half_dim - 1)
    b = time.shape[0]

    if batch_tile is None:
        # Cap one output buffer at ~8 MiB so the double-buffered block stays
        # well inside the scoped VMEM limit on all of v5e / v6e / v7x.
        rows_cap = max(8, ((8 * 1024 * 1024) // (4 * dim)) // 8 * 8)
        max_rows = min(max_tile, rows_cap)
        # Enough tiles to respect the cap AND give >= 2 grid steps for larger
        # batches (so "parallel" shards across v7x's 2 TensorCores), while
        # keeping row padding minimal.
        n_tiles = max(pl.cdiv(b, max_rows), 2 if b >= 16 else 1)
        batch_tile = pl.cdiv(pl.cdiv(b, n_tiles), 8) * 8
    assert batch_tile % 8 == 0

    b_pad = pl.cdiv(b, batch_tile) * batch_tile

    time2d = time.astype(jnp.float32).reshape(b, 1)
    if b_pad != b:
        time2d = jnp.pad(time2d, ((0, b_pad - b), (0, 0)))

    grid = (b_pad // batch_tile,)
    lane_aligned = (half_dim % 128 == 0)

    out_padded = pl.pallas_call(
        partial(_sinusoidal_kernel, half_dim=half_dim, emb_scale=emb_scale,
                lane_aligned=lane_aligned),
        out_shape=jax.ShapeDtypeStruct((b_pad, dim), jnp.float32),
        grid=grid,
        in_specs=[
            pl.BlockSpec((batch_tile, 1), lambda i: (i, 0)),      # time column tile
        ],
        out_specs=pl.BlockSpec((batch_tile, dim), lambda i: (i, 0)),
        compiler_params=pltpu.CompilerParams(
            dimension_semantics=("parallel",),                    # independent rows
        ),
    )(time2d)

    return out_padded if b_pad == b else out_padded[:b]


def _reference(time: jax.Array, dim: int) -> jax.Array:
    half_dim = dim // 2
    emb = math.log(10000.0) / (half_dim - 1)
    emb = jnp.exp(jnp.arange(half_dim, dtype=jnp.float32) * -emb)
    emb = time.astype(jnp.float32)[:, None] * emb[None, :]
    return jnp.concatenate([jnp.sin(emb), jnp.cos(emb)], axis=-1)


if __name__ == "__main__":
    key = jax.random.PRNGKey(0)

    # Small shapes consistent with the module (no weights, only `dim`).
    # dim=32 exercises the non-lane-aligned (select-store) path.
    B, DIM = 8, 32
    time = jax.random.uniform(key, (B,), dtype=jnp.float32, minval=0.0, maxval=1000.0)

    out = jax.block_until_ready(sinusoidal_pos_emb(time, DIM))
    ref = _reference(time, DIM)
    assert out.shape == (B, DIM), out.shape
    assert out.dtype == jnp.float32, out.dtype
    assert jnp.allclose(out, ref, atol=1e-5, rtol=1e-5), float(jnp.max(jnp.abs(out - ref)))

    # Larger, non-multiple-of-8 batch with lane-aligned halves (dim=256):
    # exercises tiling (2 grid steps), minimal padding (1030 -> 1040), and the
    # two-slice-store path.
    B2, DIM2 = 1030, 256
    time2 = jax.random.uniform(jax.random.PRNGKey(1), (B2,), dtype=jnp.float32,
                               minval=0.0, maxval=1000.0)
    out2 = jax.block_until_ready(sinusoidal_pos_emb(time2, DIM2))
    ref2 = _reference(time2, DIM2)
    assert out2.shape == (B2, DIM2), out2.shape
    assert jnp.allclose(out2, ref2, atol=1e-5, rtol=1e-5), float(jnp.max(jnp.abs(out2 - ref2)))

    print("KERNEL_OK")
</pallas_src>

<mosaic_0001>
module attributes {stable_mosaic.version = 11 : i64} {
  func.func @_sinusoidal_kernel(%arg0: i32, %arg1: memref<8x1xf32, #tpu.memory_space<vmem>>, %arg2: memref<8x32xf32, #tpu.memory_space<vmem>>) attributes {dimension_semantics = [#tpu.dimension_semantics<parallel>], iteration_bounds = array<i64: 1>, scalar_prefetch = 0 : i64, scratch_operands = 0 : i64, tpu.core_type = #tpu.core_type<tc>, window_params = [{transform_indices = @transform_0, window_bounds = array<i64: 8, 1>}, {transform_indices = @transform_1, window_bounds = array<i64: 8, 32>}]} {
    %c0 = arith.constant 0 : index
    %c0_0 = arith.constant 0 : index
    %0 = vector.load %arg1[%c0, %c0_0] : memref<8x1xf32, #tpu.memory_space<vmem>>, vector<8x1xf32>
    %1 = tpu.iota {dimensions = array<i32: 1>} : vector<1x32xi32>
    %c16_i32 = arith.constant 16 : i32
    %2 = vector.broadcast %c16_i32 : i32 to vector<1x32xi32>
    %3 = arith.cmpi sge, %1, %2 : vector<1x32xi32>
    %c16_i32_1 = arith.constant 16 : i32
    %4 = vector.broadcast %c16_i32_1 : i32 to vector<1x32xi32>
    %5 = arith.subi %1, %4 : vector<1x32xi32>
    %6 = arith.select %3, %5, %1 : vector<1x32xi1>, vector<1x32xi32>
    %7 = arith.sitofp %6 : vector<1x32xi32> to vector<1x32xf32>
    %cst = arith.constant -0.614022672 : f32
    %8 = vector.broadcast %cst : f32 to vector<1x32xf32>
    %9 = arith.mulf %7, %8 : vector<1x32xf32>
    %10 = math.exp %9 : vector<1x32xf32>
    %11 = vector.broadcast %0 : vector<8x1xf32> to vector<8x32xf32>
    %12 = vector.broadcast %10 : vector<1x32xf32> to vector<8x32xf32>
    %13 = arith.mulf %11, %12 : vector<8x32xf32>
    %14 = math.cos %13 : vector<8x32xf32>
    %15 = math.sin %13 : vector<8x32xf32>
    %16 = vector.shape_cast %3 : vector<1x32xi1> to vector<1x32xi1>
    %17 = vector.broadcast %16 : vector<1x32xi1> to vector<8x32xi1>
    %18 = arith.select %17, %14, %15 : vector<8x32xi1>, vector<8x32xf32>
    %c0_2 = arith.constant 0 : index
    %c0_3 = arith.constant 0 : index
    %19 = vector.load %arg2[%c0_2, %c0_3] : memref<8x32xf32, #tpu.memory_space<vmem>>, vector<8x32xf32>
    tpu.vector_store %arg2[%c0_2, %c0_3], %18 {strides = array<i32>} : memref<8x32xf32, #tpu.memory_space<vmem>>, vector<8x32xf32>,
    return
  }
  func.func @transform_0(%arg0: i32) -> (i32, i32) {
    %c0_i32 = arith.constant 0 : i32
    %c0_i32_0 = arith.constant 0 : i32
    return %arg0, %c0_i32 : i32, i32
  }
  func.func @transform_1(%arg0: i32) -> (i32, i32) {
    %c0_i32 = arith.constant 0 : i32
    %c0_i32_0 = arith.constant 0 : i32
    return %arg0, %c0_i32 : i32, i32
  }
}

</mosaic_0001>

<bundles_post_ra>
// kernel: tpu_custom_call.1
= control target key start
LH: loop header
LB: loop body
LE: loop exit
PB: predicated region body
PF: predicated region fallthrough
CT: control target
= control target key end

     0   :  { %v303_v1 = vmov 0   ;;  %s366_s0 = inlined_call_operand.vmem [shape: f32[8,1], index: 0, kind: input, shape index: {}]   ;;  %s367_s1 = inlined_call_operand.hbm [shape: f32[8,32], index: 1, kind: output, shape index: {}]  }
   0x1   :  { %v9_v0 = vld [vmem:[%s366_s0] sm:$0xff]  ;;  %272 = vset.pattern.permute.xlu0 %v303_v1 }
   0x2   :  { %21 = vperm.xlu0 %272, %v9_v0  }
   0x3   :  { %6 = vsyncpa [#allocation3], 0  ;;  %v10_v2 = vlaneseq  ;;  %v304_v22 = vmov 683565275   ;;  %v305_v24 = vmov 2475754826  }
   0x4   :  { %v306_v27 = vmov 2131351028   ;;  %v307_v30 = vmov 2102212464   ;;  %v308_v33 = vmov 920167782  }
   0x5   :  { %v324_v3 = vand.u32 127, %v10_v2  ;;  %v309_v36 = vmov 1326507024   ;;  %s310_s0 = smov [#allocation2]  }
   0x6   :  { %s243_s8 = sshll.u32 %s310_s0, 4  ;;  %s244_s8 = int_to_ptr.vmem [resolvable:$true] %s243_s8 }
   0x7   :  { %v251_v4 = vadd.s32 4294967280, %v324_v3  ;;  %vm12_vm0 = vcmp.ge.s32.totalorder %v324_v3, 16  ;;  %s279_s9 = scalar_lea.vmem %s244_s8, 128  ;;  %p284_p1 = scmp.lt.s32.totalorder %s244_s8, %s244_s8 }
   0x8   :  { %p280_p0 = scmp.ne.s32.totalorder %s244_s8, %s279_s9  ;;  %p285_p2 = scmp.lt.s32.totalorder %s279_s9, %s279_s9 }
   0x9   :  { %v14_v5 = vsel %vm12_vm0, %v251_v4, %v324_v3 }
   0xa   :  { %v15_v6 = vcvt.s32.f32 %v14_v5  ;;  %p286_p3 = por %p285_p2, %p284_p1 }
   0xc   :  { %v16_v7 = vmul.f32 -0.6140227, %v15_v6  ;;  %p287_p4 = pnand %p286_p3, %p280_p0 }
   0xe   :  { %v17_v8 = vmul.f32 1.442695, %v16_v7 }
  0x10   :  { %273 = vpow2.f32 %v17_v8 }
  0x1a   :  { %v274_v9 = vpop.eup %273 }
  0x81   :  { %v22_v10 = vpop.permute.xlu0 %21 }
  0x82   :  { %v331_v11 = vmul.f32 %v274_v9, %v22_v10 }
  0x84   :  { %v28_v12 = vand.u32 2139095040, %v331_v11  ;;  %v25_v16 = vand.u32 2147483647, %v331_v11  ;;  %vm27_vm8 = vcmp.lt.s32.totalorder %v331_v11, 0 }
  0x86   :  { %v29_v13 = vshrl.u32 %v28_v12, 23  ;;  %v32_v19 = vand.u32 8388607, %v25_v16  ;;  %vm26_vm9 = vcmp.le.f32.partialorder %v25_v16, 0.7853982 }
  0x88   :  { %v252_v14 = vadd.s32 4294967169, %v29_v13  ;;  %v33_v38 = vor.u32 8388608, %v32_v19 }
  0x8a   :  { %v35_v15 = vadd.s32 1, %v252_v14  ;;  %v73_v52 = vshll.u32 %v33_v38, 8 }
  0x8c   :  { %vm36_vm1 = vcmp.gt.s32.totalorder %v35_v15, 0 }
  0x8d   :  { %v37_v17 = vsel %vm36_vm1, %v35_v15, 0  ;;  %vm117_vm1 = vweird.f32 %v331_v11 }
  0x8e   :  { %v39_v18 = vand.u32 31, %v37_v17  ;;  %v38_v21 = vshrl.u32 %v37_v17, 5 }
  0x90   :  { %v40_v20 = vsub.s32 32, %v39_v18  ;;  %v42_v23 = vshll.u32 %v304_v22, %v39_v18  ;;  %v45_v25 = vshll.u32 %v305_v24, %v39_v18  ;;  %v48_v29 = vshll.u32 %v306_v27, %v39_v18 }
  0x91   :  { %v51_v32 = vshll.u32 %v307_v30, %v39_v18  ;;  %v54_v35 = vshll.u32 %v308_v33, %v39_v18  ;;  %vm57_vm2 = vcmp.lt.s32.totalorder %v38_v21, 1  ;;  %vm60_vm3 = vcmp.lt.s32.totalorder %v38_v21, 4 }
  0x92   :  { %v43_v26 = vshrl.u32 %v305_v24, %v40_v20  ;;  %v46_v28 = vshrl.u32 %v306_v27, %v40_v20  ;;  %v49_v31 = vshrl.u32 %v307_v30, %v40_v20  ;;  %v52_v34 = vshrl.u32 %v308_v33, %v40_v20 }
  0x93   :  { %v55_v37 = vshrl.u32 %v309_v36, %v40_v20  ;;  %v41_v47 = vshrl.u32 %v304_v22, %v40_v20  ;;  %vm59_vm4 = vcmp.lt.s32.totalorder %v38_v21, 3  ;;  %vm58_vm5 = vcmp.lt.s32.totalorder %v38_v21, 2 }
  0x94   :  { %v44_v39 = vor.u32 %v43_v26, %v42_v23  ;;  %v47_v40 = vor.u32 %v46_v28, %v45_v25  ;;  %v50_v41 = vor.u32 %v49_v31, %v48_v29  ;;  %v53_v42 = vor.u32 %v52_v34, %v51_v32 }
  0x95   :  { %v56_v43 = vor.u32 %v55_v37, %v54_v35 }
  0x96   :  { %v62_v44 = vsel %vm60_vm3, %v50_v41, 2102212464  ;;  %v65_v45 = vsel %vm57_vm2, %v44_v39, %v47_v40  ;;  %v69_v46 = vsel %vm57_vm2, %v47_v40, %v50_v41  ;;  %v66_v48 = vsel %vm60_vm3, %v53_v42, 920167782 }
  0x97   :  { %v70_v49 = vsel %vm60_vm3, %v56_v43, 1326507024  ;;  %v67_v50 = vsel %vm59_vm4, %v50_v41, %v66_v48  ;;  %v61_v53 = vsel %vm57_vm2, %v41_v47, %v44_v39  ;;  %v63_v54 = vsel %vm59_vm4, %v47_v40, %v62_v44 }
  0x98   :  { %v71_v51 = vsel %vm59_vm4, %v53_v42, %v70_v49  ;;  %v68_v55 = vsel %vm58_vm5, %v65_v45, %v67_v50  ;;  %v64_v61 = vsel %vm58_vm5, %v61_v53, %v63_v54  ;;  %vm235_vm2 = vcmask 261120  }
  0x99   :  { %v72_v56 = vsel %vm58_vm5, %v69_v46, %v71_v51  ;;  %v340_v59 = vmul.u32.u64.low %v73_v52, %v68_v55  ;;  %v341_v60 = vmul.u32.u64.high %v73_v52, %v68_v55, %v340_v59  ;;  %v80_v63 = vmul.u32 %v73_v52, %v64_v61 }
  0x9a   :  { %v337_v57 = vmul.u32.u64.low %v73_v52, %v72_v56  ;;  %v338_v58 = vmul.u32.u64.high %v73_v52, %v72_v56, %v337_v57 }
  0x9b   :  { %v83_v62 = vadd.s32 1, %v341_v60 }
  0x9c   :  { %vm82_vm6 = vc.u32 %v338_v58, %v340_v59  ;;  %v81_v13 = vadd.s32 %v340_v59, %v338_v58 }
  0x9d   :  { %v84_v0 = vsel %vm82_vm6, %v83_v62, %v341_v60 }
  0x9e   :  { %v85_v1 = vadd.s32 %v84_v0, %v80_v63 }
  0xa0   :  { %v86_v2 = vadd.s32 536870912, %v85_v1 }
  0xa2   :  { %v87_v4 = vshrl.u32 %v86_v2, 30 }
  0xa4   :  { %v88_v5 = vshll.u32 %v87_v4, 30  ;;  %v111_v26 = vsub.s32 4, %v87_v4 }
  0xa6   :  { %v89_v6 = vsub.s32 %v85_v1, %v88_v5  ;;  %v112_v29 = vsel %vm27_vm8, %v111_v26, %v87_v4 }
  0xa7   :  { %v114_v31 = vsel %vm26_vm9, 0, %v112_v29 }
  0xa8   :  { %v91_v7 = vsub.s32 0, %v89_v6  ;;  %v221_v32 = vadd.s32 3, %v114_v31  ;;  %v118_v33 = vand.u32 3, %v114_v31 }
  0xaa   :  { %v253_v8 = vmin.u32 %v91_v7, %v89_v6  ;;  %v222_v34 = vand.u32 3, %v221_v32  ;;  %vm123_vm10 = vcmp.eq.s32.totalorder %v118_v33, 2  ;;  %vm120_vm12 = vcmp.eq.s32.totalorder %v118_v33, 0 }
  0xab   :  { %vm119_vm14 = vcmp.lt.s32.totalorder %v118_v33, 2 }
  0xac   :  { %v93_v9 = vclz %v253_v8  ;;  %vm227_vm11 = vcmp.eq.s32.totalorder %v222_v34, 2  ;;  %vm224_vm13 = vcmp.eq.s32.totalorder %v222_v34, 0  ;;  %vm223_vm15 = vcmp.lt.s32.totalorder %v222_v34, 2 }
  0xae   :  { %v254_v10 = vadd.s32 4294967294, %v93_v9 }
  0xb0   :  { %vm255_vm7 = vcmp.lt.s32.totalorder %v254_v10, 0 }
  0xb1   :  { %v96_v12 = vsel %vm255_vm7, 0, %v254_v10 }
  0xb2   :  { %v97_v14 = vsub.s32 32, %v96_v12  ;;  %v101_v15 = vsub.s32 4294967266, %v96_v12  ;;  %v98_v17 = vshll.u32 %v89_v6, %v96_v12 }
  0xb4   :  { %v99_v18 = vshrl.u32 %v81_v13, %v97_v14  ;;  %v102_v19 = vadd.s32 127, %v101_v15 }
  0xb6   :  { %v100_v20 = vor.u32 %v99_v18, %v98_v17  ;;  %v103_v21 = vshll.u32 %v102_v19, 23 }
  0xb8   :  { %v104_v22 = vor.u32 4788187, %v103_v21  ;;  %v107_v24 = vcvt.s32.f32 %v100_v20 }
  0xba   :  { %v105_v23 = vand.u32 2147483647, %v104_v22 }
  0xbc   :  { %v108_v25 = vmul.f32 %v107_v24, %v105_v23 }
  0xbe   :  { %v109_v27 = vxor.u32 2147483648, %v108_v25 }
  0xc0   :  { %v110_v28 = vsel %vm27_vm8, %v109_v27, %v108_v25 }
  0xc1   :  { %v113_v30 = vsel %vm26_vm9, %v331_v11, %v110_v28 }
  0xc2   :  { %275 = vcosq.f32 %v113_v30 }
  0xc3   :  { %277 = vsinq.f32 %v113_v30 }
  0xcc   :  { %v276_v35 = vpop.eup %275 }
  0xcd   :  { %v278_v36 = vpop.eup %277  ;;  %v124_v37 = vxor.u32 2147483648, %v276_v35 }
  0xce   :  { %v121_v38 = vxor.u32 2147483648, %v278_v36 }
  0xcf   :  { %v125_v39 = vsel %vm123_vm10, %v124_v37, %v278_v36  ;;  %v229_v16 = vsel %vm227_vm11, %v124_v37, %v278_v36 }
  0xd0   :  { %v122_v40 = vsel %vm120_vm12, %v276_v35, %v121_v38  ;;  %v226_v41 = vsel %vm224_vm13, %v276_v35, %v121_v38 }
  0xd1   :  { %v126_v42 = vsel %vm119_vm14, %v122_v40, %v125_v39  ;;  %v230_v43 = vsel %vm223_vm15, %v226_v41, %v229_v16 }
  0xd2   :  { %v127_v44 = vsel %vm117_vm1, nan, %v126_v42  ;;  %v231_v45 = vsel %vm117_vm1, nan, %v230_v43 }
  0xd3   :  { %v234_v46 = vsel %vm12_vm0, %v127_v44, %v231_v45 }
  0xd4   :  { %236 = vst.msk [vmem:[#allocation2] sm:$0xff] %vm235_vm2, %v234_v46 }
  0xd5   :  { %290 = shalt.err (!%p287_p4)
}
  0xd6   :  { %s291_s12 = scalar_lea.hbm %s367_s1, 128 }
  0xd7   :  { %p292_p5 = scmp.ne.s32.totalorder %s367_s1, %s291_s12  ;;  %p295_p6 = scmp.lt.u32.totalorder %s291_s12, %s367_s1 }
  0xd9   :  { %p297_p7 = pnand %p295_p6, %p292_p5 }
  0xdb   :  { %300 = shalt.err (!%p297_p7)
}
  0xdc   :  { %246 = dma.vmem_to_hbm [thread:$0]  %s244_s8, 128, %s367_s1, [#allocation3]  }
  0xdd   :  { %301 = dma.done.wait [#allocation3], 128  }
  0xde   :  { %302 = vsyncadd [#allocation3], 4294967168 }
  0xdf   :  { %250 = vsyncpa [#allocation3], 1 }

</bundles_post_ra>
